<compile_context>
chip_gen: v6e
topology: v6e:2x2x1
jax: 0.10.0
libtpu: 0.0.40
codegen_flags: <defaults>
</compile_context>

<pallas_src>
import jax
import jax.numpy as jnp
from jax.experimental import pallas as pl
from jax.experimental.pallas import tpu as pltpu


def _round_up(x, m):
    return ((x + m - 1) // m) * m


def _decode_kernel(s_ref, d_ref, rmu_ref):
    # s_ref: (tB, 1) per-person ability row-sums; d_ref: (1, tN) item difficulties.
    logit = s_ref[...] + d_ref[...]                    # (tB, 1) + (1, tN) -> (tB, tN)
    # sigmoid(x) == 0.5 * (tanh(0.5 * x) + 1): a single EUP op per element.
    rmu_ref[...] = (0.5 * (jnp.tanh(0.5 * logit) + 1.0)).astype(rmu_ref.dtype)


def _irt_1pl_decode_pallas(s, d_row, *, tb_max=512, tn_max=1024):
    """response_mu (B, N) = sigmoid(s + d_row), computed tile-by-tile on TPU.

    s:     (B, 1)  row-sums of reparameterized ability
    d_row: (1, N)  reparameterized item difficulties (lane-dense layout)
    """
    B = s.shape[0]
    N = d_row.shape[1]
    dtype = s.dtype

    # Lane-dense tiles: tB multiple of 8 (sublane), tN multiple of 128 (lane).
    tb = min(tb_max, _round_up(B, 8))
    tn = min(tn_max, _round_up(N, 128))
    b_pad = _round_up(B, tb)
    n_pad = _round_up(N, tn)

    s_p = s if b_pad == B else jnp.pad(s, ((0, b_pad - B), (0, 0)))
    d_p = d_row if n_pad == N else jnp.pad(d_row, ((0, 0), (0, n_pad - N)))

    grid = (b_pad // tb, n_pad // tn)

    cost = pl.CostEstimate(
        flops=3 * b_pad * n_pad,
        transcendentals=b_pad * n_pad,
        bytes_accessed=4 * (b_pad * n_pad + b_pad * grid[1] + n_pad * grid[0]),
    )

    rmu_p = pl.pallas_call(
        _decode_kernel,
        out_shape=jax.ShapeDtypeStruct((b_pad, n_pad), dtype),
        grid_spec=pltpu.PrefetchScalarGridSpec(
            num_scalar_prefetch=0,
            grid=grid,
            in_specs=[
                pl.BlockSpec((tb, 1), lambda i, j: (i, 0)),   # ability row-sums: B-tiled only
                pl.BlockSpec((1, tn), lambda i, j: (0, j)),   # difficulties: N-tiled only
            ],
            out_specs=pl.BlockSpec((tb, tn), lambda i, j: (i, j)),
        ),
        compiler_params=pltpu.CompilerParams(
            dimension_semantics=("parallel", "parallel"),
        ),
        cost_estimate=cost,
    )(s_p, d_p)

    if b_pad == B and n_pad == N:
        return rmu_p
    return rmu_p[:B, :N]


def init_params(key, latent_dim, num_person, num_item, dtype=jnp.float32):
    # nn.Embedding default init is N(0, 1); weights_init does not touch embeddings.
    k1, k2, k3, k4 = jax.random.split(key, 4)
    item_feat_dim = 1  # _set_item_feat_dim for 1PL
    return {
        "ability_mu": jax.random.normal(k1, (num_person, latent_dim), dtype),
        "ability_logvar": jax.random.normal(k2, (num_person, latent_dim), dtype),
        "item_mu": jax.random.normal(k3, (num_item, item_feat_dim), dtype),
        "item_logvar": jax.random.normal(k4, (num_item, item_feat_dim), dtype),
    }


def vi_1pl_forward(params, index, response, mask, eps_key):
    """Mirrors VI_1PL.forward(index, response, mask)."""
    # --- encode glue: embedding lookups (gather) stay in plain JAX ---
    ability_mu = params["ability_mu"][index]            # (B, D)
    ability_logvar = params["ability_logvar"][index]    # (B, D)
    item_mu = params["item_mu"]                          # (N, 1)
    item_logvar = params["item_logvar"]                  # (N, 1)

    B, D = ability_mu.shape
    N = item_mu.shape[0]

    # Deterministic gaussian noise for the reparameterization (torch.randn_like analogue).
    ka, ki = jax.random.split(eps_key)
    ability_eps = jax.random.normal(ka, (B, D), ability_mu.dtype)
    item_eps = jax.random.normal(ki, (N, 1), item_mu.dtype)

    # Tiny O(B*D + N) reparameterizations + D-wide row-sum stay in plain JAX
    # (they would be lane-sparse filler inside the kernel).
    ability = ability_eps * jnp.exp(0.5 * ability_logvar) + ability_mu     # (B, D)
    item_feat = item_eps * jnp.exp(0.5 * item_logvar) + item_mu            # (N, 1)
    s = jnp.sum(ability, axis=1, keepdims=True)                            # (B, 1)
    d_row = item_feat.reshape(1, N)                                        # lane-dense difficulties

    # Dominant (B, N) decode runs in the Pallas kernel.
    # TODO(synk): for tiny B*N (< ~1e6) a fused XLA elementwise op would be equally fast; the
    # kernel is always used here so the Pallas path is exercised.
    rmu = _irt_1pl_decode_pallas(s, d_row)                                 # (B, N)
    response_mu = rmu[..., None]                                           # (B, N, 1)

    return (response, mask, response_mu, ability, ability_mu, ability_logvar,
            item_feat, item_mu, item_logvar)


def _reference_forward(params, index, response, mask, eps_key):
    """Pure-JAX reference for sanity checking (same eps draws as the kernel path)."""
    ability_mu = params["ability_mu"][index]
    ability_logvar = params["ability_logvar"][index]
    item_mu = params["item_mu"]
    item_logvar = params["item_logvar"]
    B, D = ability_mu.shape
    N = item_mu.shape[0]
    ka, ki = jax.random.split(eps_key)
    ability_eps = jax.random.normal(ka, (B, D), ability_mu.dtype)
    item_eps = jax.random.normal(ki, (N, 1), item_mu.dtype)
    ability = ability_eps * jnp.exp(0.5 * ability_logvar) + ability_mu
    item_feat = item_eps * jnp.exp(0.5 * item_logvar) + item_mu
    logit = (jnp.sum(ability, axis=1, keepdims=True) + item_feat.T)[..., None]
    return jax.nn.sigmoid(logit), ability, item_feat


if __name__ == "__main__":
    latent_dim = 4
    num_person = 16
    num_item = 32
    batch = 8

    key = jax.random.PRNGKey(0)
    kp, kidx, kresp, keps = jax.random.split(key, 4)

    params = init_params(kp, latent_dim, num_person, num_item)
    index = jax.random.randint(kidx, (batch,), 0, num_person)
    response = jax.random.bernoulli(kresp, 0.5, (batch, num_item, 1)).astype(jnp.float32)
    mask = jnp.ones((batch, num_item, 1), jnp.float32)

    out = vi_1pl_forward(params, index, response, mask, keps)
    out = jax.block_until_ready(out)

    (_, _, response_mu, ability, ability_mu, ability_logvar,
     item_feat, item_mu, item_logvar) = out

    # Sanity check against the pure-JAX reference (same noise draws).
    ref_rmu, ref_ability, ref_item = _reference_forward(params, index, response, mask, keps)
    assert response_mu.shape == (batch, num_item, 1)
    assert ability.shape == (batch, latent_dim)
    assert item_feat.shape == (num_item, 1)
    assert jnp.allclose(response_mu, ref_rmu, atol=1e-5)
    assert jnp.allclose(ability, ref_ability, atol=1e-5)
    assert jnp.allclose(item_feat, ref_item, atol=1e-5)

    print("KERNEL_OK")
</pallas_src>

<mosaic_0001>
module attributes {stable_mosaic.version = 11 : i64} {
  func.func @_decode_kernel(%arg0: i32, %arg1: i32, %arg2: memref<8x1xf32, #tpu.memory_space<vmem>>, %arg3: memref<1x128xf32, #tpu.memory_space<vmem>>, %arg4: memref<8x128xf32, #tpu.memory_space<vmem>>) attributes {dimension_semantics = [#tpu.dimension_semantics<parallel>, #tpu.dimension_semantics<parallel>], iteration_bounds = array<i64: 1, 1>, scalar_prefetch = 0 : i64, scratch_operands = 0 : i64, tpu.core_type = #tpu.core_type<tc>, window_params = [{transform_indices = @transform_0, window_bounds = array<i64: 8, 1>}, {transform_indices = @transform_1, window_bounds = array<i64: 1, 128>}, {transform_indices = @transform_2, window_bounds = array<i64: 8, 128>}]} {
    %c0 = arith.constant 0 : index
    %c0_0 = arith.constant 0 : index
    %0 = vector.load %arg2[%c0, %c0_0] : memref<8x1xf32, #tpu.memory_space<vmem>>, vector<8x1xf32>
    %c0_1 = arith.constant 0 : index
    %c0_2 = arith.constant 0 : index
    %1 = vector.load %arg3[%c0_1, %c0_2] : memref<1x128xf32, #tpu.memory_space<vmem>>, vector<1x128xf32>
    %2 = vector.broadcast %0 : vector<8x1xf32> to vector<8x128xf32>
    %3 = vector.broadcast %1 : vector<1x128xf32> to vector<8x128xf32>
    %4 = arith.addf %2, %3 : vector<8x128xf32>
    %cst = arith.constant 5.000000e-01 : f32
    %5 = vector.broadcast %cst : f32 to vector<8x128xf32>
    %6 = arith.mulf %5, %4 : vector<8x128xf32>
    %7 = math.tanh %6 : vector<8x128xf32>
    %cst_3 = arith.constant 1.000000e+00 : f32
    %8 = vector.broadcast %cst_3 : f32 to vector<8x128xf32>
    %9 = arith.addf %7, %8 : vector<8x128xf32>
    %cst_4 = arith.constant 5.000000e-01 : f32
    %10 = vector.broadcast %cst_4 : f32 to vector<8x128xf32>
    %11 = arith.mulf %10, %9 : vector<8x128xf32>
    %c0_5 = arith.constant 0 : index
    %c0_6 = arith.constant 0 : index
    %12 = vector.load %arg4[%c0_5, %c0_6] : memref<8x128xf32, #tpu.memory_space<vmem>>, vector<8x128xf32>
    tpu.vector_store %arg4[%c0_5, %c0_6], %11 {strides = array<i32>} : memref<8x128xf32, #tpu.memory_space<vmem>>, vector<8x128xf32>,
    return
  }
  func.func @transform_0(%arg0: i32, %arg1: i32) -> (i32, i32) {
    %c0_i32 = arith.constant 0 : i32
    %c0_i32_0 = arith.constant 0 : i32
    return %arg0, %c0_i32 : i32, i32
  }
  func.func @transform_1(%arg0: i32, %arg1: i32) -> (i32, i32) {
    %c0_i32 = arith.constant 0 : i32
    %c0_i32_0 = arith.constant 0 : i32
    return %c0_i32, %arg1 : i32, i32
  }
  func.func @transform_2(%arg0: i32, %arg1: i32) -> (i32, i32) {
    %c0_i32 = arith.constant 0 : i32
    return %arg0, %arg1 : i32, i32
  }
}

</mosaic_0001>

<bundles_post_ra>
// kernel: tpu_custom_call.1
= control target key start
LH: loop header
LB: loop body
LE: loop exit
PB: predicated region body
PF: predicated region fallthrough
CT: control target
= control target key end

     0   :  { %s99_s0 = inlined_call_operand.vmem [shape: f32[8,1], index: 0, kind: input, shape index: {}]   ;;  %s100_s1 = inlined_call_operand.vmem [shape: f32[1,128], index: 1, kind: input, shape index: {}]   ;;  %s101_s2 = inlined_call_operand.hbm [shape: f32[8,128], index: 2, kind: output, shape index: {}]  }
   0x1   :  { %v12_v0 = vld [vmem:[%s99_s0] sm:$0xff] }
   0x2   :  { %7 = vsyncpa [#allocation3], 0  ;;  %v73_v1 = vmov 0   ;;  %v45_v2 = vld [vmem:[%s100_s1] ss:$0 sm:$0xff]  ;;  %s74_s13 = smov [#allocation2]  }
   0x3   :  { %48 = vset.pattern.permute.xlu0 %v73_v1  ;;  %s37_s14 = sshll.u32 %s74_s13, 4  ;;  %s38_s14 = int_to_ptr.vmem [resolvable:$true] %s37_s14 }
   0x4   :  { %16 = vperm.xlu0 %48, %v12_v0   ;;  %s51_s0 = scalar_lea.vmem %s38_s14, 128  ;;  %p56_p1 = scmp.lt.s32.totalorder %s38_s14, %s38_s14 }
   0x5   :  { %p52_p0 = scmp.ne.s32.totalorder %s38_s14, %s51_s0  ;;  %p57_p2 = scmp.lt.s32.totalorder %s51_s0, %s51_s0 }
   0x7   :  { %p58_p3 = por %p57_p2, %p56_p1 }
   0x9   :  { %p59_p4 = pnand %p58_p3, %p52_p0 }
  0x7f   :  { %v17_v3 = vpop.permute.xlu0 %16 }
  0x80   :  { %v25_v4 = vadd.f32 %v45_v2, %v17_v3 }
  0x82   :  { %v26_v5 = vmul.f32 0.5, %v25_v4 }
  0x84   :  { %49 = vtanh.f32 %v26_v5 }
  0x91   :  { %v50_v6 = vpop.eup %49 }
  0x92   :  { %v28_v7 = vadd.f32 1.0, %v50_v6 }
  0x94   :  { %v29_v8 = vmul.f32 0.5, %v28_v7 }
  0x96   :  { %30 = vst [vmem:[#allocation2] sm:$0xff] %v29_v8 }
  0x97   :  { %62 = shalt.err (!%p59_p4)
}
  0x98   :  { %40 = dma.vmem_to_hbm [thread:$0]  %s38_s14, 128, %s101_s2, [#allocation3]  }
  0x99   :  { %71 = dma.done.wait [#allocation3], 128  }
  0x9a   :  { %72 = vsyncadd [#allocation3], 4294967168 }
  0x9b   :  { %44 = vsyncpa [#allocation3], 1 }

</bundles_post_ra>
